<compile_context>
chip_gen: v7x
topology: tpu7x:2x2x1
jax: 0.10.0
libtpu: 0.0.40
codegen_flags: <defaults>
</compile_context>

<pallas_src>
import jax
import jax.numpy as jnp
from jax.experimental import pallas as pl
from jax.experimental.pallas import tpu as pltpu

HIDDEN = 64        # logical hidden width of the PyTorch module
HIDDEN_PAD = 128   # lane-padded width used inside the kernel


def _round_up(x, m):
    return ((x + m - 1) // m) * m


def _choose_tile(batch):
    """Batch tile: 8 for tiny batches, else >=2 grid steps, capped at 512 rows."""
    batch = max(batch, 1)
    if batch <= 8:
        return _round_up(batch, 8)
    # >= 2 grid steps so v7x's two TensorCores both get a tile; cap at 512 so
    # the (tb, 128) f32 intermediates stay comfortably within vregs/VMEM.
    return min(512, _round_up(-(-batch // 2), 8))


def policy_kernel(x_ref, w1_ref, w23_ref, bias_ref, loc_ref):
    """One batch tile: loc = fc3(tanh(fc2(tanh(fc1(x))))), all 128 lanes wide."""
    x = x_ref[...]
    # fc1 + tanh (accumulate f32; bias add + tanh in f32 -- v5e has no bf16 VPU/EUP).
    h1 = jnp.tanh(
        jnp.dot(x, w1_ref[...], preferred_element_type=jnp.float32)
        + bias_ref[0:1, :])
    # fc2 + tanh  (w2 = rows [0:128) of the packed weight block).
    h2 = jnp.tanh(
        jnp.dot(h1.astype(w23_ref.dtype), w23_ref[:HIDDEN_PAD, :],
                preferred_element_type=jnp.float32)
        + bias_ref[1:2, :])
    # fc3 (w3 = rows [128:256)); padding rows/cols are exact zeros, so lanes
    # [out_features:128) of the result are exact zeros.  Full-width store.
    loc_ref[...] = (
        jnp.dot(h2.astype(w23_ref.dtype), w23_ref[HIDDEN_PAD:, :],
                preferred_element_type=jnp.float32)
        + bias_ref[2:3, :])


def policy_forward(x, packed):
    """x: (B, in_features) f32.  Returns (loc, scale), each (B, out_features) f32."""
    B, in_features = x.shape
    assert in_features == packed["in_features"]
    out_features = packed["out_features"]
    compute_dtype = packed["dtype"]

    tb = _choose_tile(B)
    b_pad = _round_up(B, tb)
    x = x.astype(compute_dtype)
    if b_pad != B:
        x = jnp.pad(x, ((0, b_pad - B), (0, 0)))

    itemsize = jnp.dtype(compute_dtype).itemsize
    cost = pl.CostEstimate(
        flops=2 * b_pad * (in_features + 2 * HIDDEN_PAD) * HIDDEN_PAD,
        transcendentals=2 * b_pad * HIDDEN_PAD,
        bytes_accessed=(b_pad * in_features * itemsize          # x stream in
                        + b_pad * HIDDEN_PAD * 4                # loc stream out
                        + (packed["w1"].size + packed["w23"].size) * itemsize
                        + packed["biases"].size * 4),
    )

    loc_pad = pl.pallas_call(
        policy_kernel,
        out_shape=jax.ShapeDtypeStruct((b_pad, HIDDEN_PAD), jnp.float32),
        grid=(b_pad // tb,),
        in_specs=[
            pl.BlockSpec((tb, in_features), lambda i: (i, 0)),          # streamed
            pl.BlockSpec((in_features, HIDDEN_PAD), lambda i: (0, 0)),  # resident w1
            pl.BlockSpec((2 * HIDDEN_PAD, HIDDEN_PAD), lambda i: (0, 0)),  # resident w2|w3
            pl.BlockSpec((3, HIDDEN_PAD), lambda i: (0, 0)),            # resident biases
        ],
        out_specs=pl.BlockSpec((tb, HIDDEN_PAD), lambda i: (i, 0)),     # lane-dense
        compiler_params=pltpu.CompilerParams(
            dimension_semantics=("parallel",)),
        cost_estimate=cost,
    )(x, packed["w1"], packed["w23"], packed["biases"])

    loc = loc_pad[:B, :out_features]
    # scale = exp(log_scale).expand_as(loc); exp precomputed at pack time.
    scale = jnp.broadcast_to(packed["scale_row"], loc.shape)
    return loc, scale


def init_policy_params(key, in_features, out_features, hidden=HIDDEN):
    """Deterministic init mimicking PyTorch nn.Linear (uniform +-1/sqrt(fan_in))."""
    def linear(k, fan_in, fan_out):
        kw, kb = jax.random.split(k)
        bound = 1.0 / jnp.sqrt(jnp.float32(fan_in))
        w = jax.random.uniform(kw, (fan_in, fan_out), jnp.float32, -bound, bound)
        b = jax.random.uniform(kb, (1, fan_out), jnp.float32, -bound, bound)
        return w, b

    k1, k2, k3 = jax.random.split(key, 3)
    w1, b1 = linear(k1, in_features, hidden)
    w2, b2 = linear(k2, hidden, hidden)
    w3, b3 = linear(k3, hidden, out_features)
    log_scale = jnp.full((1, out_features), -0.5, jnp.float32)  # nn.init.constant_(-0.5)
    return dict(w1=w1, b1=b1, w2=w2, b2=b2, w3=w3, b3=b3, log_scale=log_scale)


def pack_policy_params(p, use_bf16=False):
    """Pack raw params into the lane-padded 4-operand layout the kernel expects.

    use_bf16=True: bf16 MXU operands (x / w1 / w23) for large-batch training on
    v6e/v7x; biases and all elementwise math stay f32.
    """
    in_features = p["w1"].shape[0]
    out = p["w3"].shape[1]
    assert out <= HIDDEN_PAD, "out_features must fit the 128-lane padded block"
    assert p["w2"].shape == (HIDDEN, HIDDEN)

    dtype = jnp.bfloat16 if use_bf16 else jnp.float32

    w1_pad = jnp.zeros((in_features, HIDDEN_PAD), jnp.float32).at[:, :HIDDEN].set(p["w1"])
    w2_pad = jnp.zeros((HIDDEN_PAD, HIDDEN_PAD), jnp.float32).at[:HIDDEN, :HIDDEN].set(p["w2"])
    w3_pad = jnp.zeros((HIDDEN_PAD, HIDDEN_PAD), jnp.float32).at[:HIDDEN, :out].set(p["w3"])
    w23 = jnp.concatenate([w2_pad, w3_pad], axis=0)                       # (256, 128)

    b1_pad = jnp.zeros((1, HIDDEN_PAD), jnp.float32).at[:, :HIDDEN].set(p["b1"])
    b2_pad = jnp.zeros((1, HIDDEN_PAD), jnp.float32).at[:, :HIDDEN].set(p["b2"])
    b3_pad = jnp.zeros((1, HIDDEN_PAD), jnp.float32).at[:, :out].set(p["b3"])
    biases = jnp.concatenate([b1_pad, b2_pad, b3_pad], axis=0)            # (3, 128) f32

    return dict(w1=w1_pad.astype(dtype), w23=w23.astype(dtype), biases=biases,
                scale_row=jnp.exp(p["log_scale"]),
                in_features=in_features, out_features=out, dtype=dtype)


def policy_forward_ref(x, p):
    h1 = jnp.tanh(x @ p["w1"] + p["b1"])
    h2 = jnp.tanh(h1 @ p["w2"] + p["b2"])
    loc = h2 @ p["w3"] + p["b3"]
    scale = jnp.broadcast_to(jnp.exp(p["log_scale"]), loc.shape)
    return loc, scale


# TODO(synk): Policy.act's torch.distributions sampling (Independent(Normal).sample)
# is host-side RNG, not part of the forward pass; sample with jax.random outside.

if __name__ == "__main__":
    key = jax.random.PRNGKey(0)
    k_param, k_x, k_x2 = jax.random.split(key, 3)

    batch = 8
    in_features = 24   # e.g. DMControl observation dim
    out_features = 6   # e.g. action dim

    raw = init_policy_params(k_param, in_features, out_features)
    packed = pack_policy_params(raw)                       # f32 path (inference)
    packed_bf16 = pack_policy_params(raw, use_bf16=True)   # bf16 path (training)

    # Small batch: single 8-row tile, grid=(1,), lane-dense (8,128) output block.
    x = jax.random.normal(k_x, (batch, in_features), jnp.float32)
    loc, scale = policy_forward(x, packed)
    jax.block_until_ready((loc, scale))
    loc_r, scale_r = policy_forward_ref(x, raw)
    assert loc.shape == (batch, out_features) and scale.shape == (batch, out_features)
    assert jnp.allclose(loc, loc_r, atol=1e-5, rtol=1e-5)
    assert jnp.allclose(scale, scale_r, atol=1e-6, rtol=1e-6)

    # Larger batch: tb=104, pad 200 -> 208, grid=(2,) (both v7x TCs get a tile).
    x2 = jax.random.normal(k_x2, (200, in_features), jnp.float32)
    loc2, scale2 = policy_forward(x2, packed)
    jax.block_until_ready((loc2, scale2))
    loc2_r, scale2_r = policy_forward_ref(x2, raw)
    assert loc2.shape == (200, out_features)
    assert jnp.allclose(loc2, loc2_r, atol=1e-5, rtol=1e-5)
    assert jnp.allclose(scale2, scale2_r, atol=1e-6, rtol=1e-6)

    # bf16-streamed training path (f32 accumulation / bias / tanh): loose tolerance.
    loc3, scale3 = policy_forward(x2, packed_bf16)
    jax.block_until_ready((loc3, scale3))
    assert loc3.shape == (200, out_features)
    assert jnp.allclose(loc3, loc2_r, atol=5e-2, rtol=5e-2)
    assert jnp.allclose(scale3, scale2_r, atol=1e-6, rtol=1e-6)

    print("KERNEL_OK")
</pallas_src>

<mosaic_0001>
module attributes {stable_mosaic.version = 11 : i64} {
  func.func @policy_kernel(%arg0: i32, %arg1: memref<8x24xf32, #tpu.memory_space<vmem>>, %arg2: memref<24x128xf32, #tpu.memory_space<vmem>>, %arg3: memref<256x128xf32, #tpu.memory_space<vmem>>, %arg4: memref<3x128xf32, #tpu.memory_space<vmem>>, %arg5: memref<8x128xf32, #tpu.memory_space<vmem>>) attributes {dimension_semantics = [#tpu.dimension_semantics<parallel>], iteration_bounds = array<i64: 1>, scalar_prefetch = 0 : i64, scratch_operands = 0 : i64, tpu.core_type = #tpu.core_type<tc>, window_params = [{transform_indices = @transform_0, window_bounds = array<i64: 8, 24>}, {pipeline_mode = #tpu.pipeline_mode<synchronous>, transform_indices = @transform_1, window_bounds = array<i64: 24, 128>}, {pipeline_mode = #tpu.pipeline_mode<synchronous>, transform_indices = @transform_2, window_bounds = array<i64: 256, 128>}, {pipeline_mode = #tpu.pipeline_mode<synchronous>, transform_indices = @transform_3, window_bounds = array<i64: 3, 128>}, {transform_indices = @transform_4, window_bounds = array<i64: 8, 128>}]} {
    %c0 = arith.constant 0 : index
    %c0_0 = arith.constant 0 : index
    %0 = vector.load %arg1[%c0, %c0_0] : memref<8x24xf32, #tpu.memory_space<vmem>>, vector<8x24xf32>
    %c0_1 = arith.constant 0 : index
    %c0_2 = arith.constant 0 : index
    %1 = vector.load %arg2[%c0_1, %c0_2] : memref<24x128xf32, #tpu.memory_space<vmem>>, vector<24x128xf32>
    %cst = arith.constant dense<0.000000e+00> : vector<8x128xf32>
    %2 = tpu.matmul %0, %1, %cst {dimension_numbers = #tpu.dot_dimension_numbers<[1], [0], [0], [1], [0, 0, 1, 1], [], []>} : vector<8x24xf32>, vector<24x128xf32>, vector<8x128xf32> -> vector<8x128xf32>
    %c0_3 = arith.constant 0 : index
    %c0_4 = arith.constant 0 : index
    %3 = vector.load %arg4[%c0_3, %c0_4] : memref<3x128xf32, #tpu.memory_space<vmem>>, vector<1x128xf32>
    %4 = vector.broadcast %3 : vector<1x128xf32> to vector<8x128xf32>
    %5 = arith.addf %2, %4 : vector<8x128xf32>
    %6 = math.tanh %5 : vector<8x128xf32>
    %c0_5 = arith.constant 0 : index
    %c0_6 = arith.constant 0 : index
    %7 = vector.load %arg3[%c0_5, %c0_6] : memref<256x128xf32, #tpu.memory_space<vmem>>, vector<128x128xf32>
    %cst_7 = arith.constant dense<0.000000e+00> : vector<8x128xf32>
    %8 = tpu.matmul %6, %7, %cst_7 {dimension_numbers = #tpu.dot_dimension_numbers<[1], [0], [0], [1], [0, 0, 1, 1], [], []>} : vector<8x128xf32>, vector<128x128xf32>, vector<8x128xf32> -> vector<8x128xf32>
    %c1 = arith.constant 1 : index
    %c0_8 = arith.constant 0 : index
    %9 = vector.load %arg4[%c1, %c0_8] : memref<3x128xf32, #tpu.memory_space<vmem>>, vector<1x128xf32>
    %10 = vector.broadcast %9 : vector<1x128xf32> to vector<8x128xf32>
    %11 = arith.addf %8, %10 : vector<8x128xf32>
    %12 = math.tanh %11 : vector<8x128xf32>
    %c128 = arith.constant 128 : index
    %c0_9 = arith.constant 0 : index
    %13 = vector.load %arg3[%c128, %c0_9] : memref<256x128xf32, #tpu.memory_space<vmem>>, vector<128x128xf32>
    %cst_10 = arith.constant dense<0.000000e+00> : vector<8x128xf32>
    %14 = tpu.matmul %12, %13, %cst_10 {dimension_numbers = #tpu.dot_dimension_numbers<[1], [0], [0], [1], [0, 0, 1, 1], [], []>} : vector<8x128xf32>, vector<128x128xf32>, vector<8x128xf32> -> vector<8x128xf32>
    %c2 = arith.constant 2 : index
    %c0_11 = arith.constant 0 : index
    %15 = vector.load %arg4[%c2, %c0_11] : memref<3x128xf32, #tpu.memory_space<vmem>>, vector<1x128xf32>
    %16 = vector.broadcast %15 : vector<1x128xf32> to vector<8x128xf32>
    %17 = arith.addf %14, %16 : vector<8x128xf32>
    %c0_12 = arith.constant 0 : index
    %c0_13 = arith.constant 0 : index
    %18 = vector.load %arg5[%c0_12, %c0_13] : memref<8x128xf32, #tpu.memory_space<vmem>>, vector<8x128xf32>
    tpu.vector_store %arg5[%c0_12, %c0_13], %17 {strides = array<i32>} : memref<8x128xf32, #tpu.memory_space<vmem>>, vector<8x128xf32>,
    return
  }
  func.func @transform_0(%arg0: i32) -> (i32, i32) {
    %c0_i32 = arith.constant 0 : i32
    %c0_i32_0 = arith.constant 0 : i32
    return %arg0, %c0_i32 : i32, i32
  }
  func.func @transform_1(%arg0: i32) -> (i32, i32) {
    %c0_i32 = arith.constant 0 : i32
    %c0_i32_0 = arith.constant 0 : i32
    %c0_i32_1 = arith.constant 0 : i32
    return %c0_i32, %c0_i32_0 : i32, i32
  }
  func.func @transform_2(%arg0: i32) -> (i32, i32) {
    %c0_i32 = arith.constant 0 : i32
    %c0_i32_0 = arith.constant 0 : i32
    %c0_i32_1 = arith.constant 0 : i32
    return %c0_i32, %c0_i32_0 : i32, i32
  }
  func.func @transform_3(%arg0: i32) -> (i32, i32) {
    %c0_i32 = arith.constant 0 : i32
    %c0_i32_0 = arith.constant 0 : i32
    %c0_i32_1 = arith.constant 0 : i32
    return %c0_i32, %c0_i32_0 : i32, i32
  }
  func.func @transform_4(%arg0: i32) -> (i32, i32) {
    %c0_i32 = arith.constant 0 : i32
    %c0_i32_0 = arith.constant 0 : i32
    return %arg0, %c0_i32 : i32, i32
  }
}

</mosaic_0001>

<bundles_post_ra>
// kernel: tpu_custom_call.1
= control target key start
LH: loop header
LB: loop body
LE: loop exit
PB: predicated region body
PF: predicated region fallthrough
CT: control target
= control target key end

     0   :  { %9 = vsyncpa [#allocation3], 0  ;;  %s737_s0 = inlined_call_operand.hbm [shape: f32[8,24], index: 0, kind: input, shape index: {}]   ;;  %s738_s1 = inlined_call_operand.hbm [shape: f32[24,128], index: 1, kind: input, shape index: {}]   ;;  %s739_s2 = inlined_call_operand.hbm [shape: f32[256,128], index: 2, kind: input, shape index: {}]   ;;  %s740_s3 = inlined_call_operand.vmem [shape: f32[3,128], index: 3, kind: input, shape index: {}]   ;;  %s741_s4 = inlined_call_operand.hbm [shape: f32[8,128], index: 4, kind: output, shape index: {}]  }
   0x1   :  { %10 = vsyncpa [#allocation6], 0 }
   0x2   :  { %11 = vsyncpa [#allocation4], 0  ;;  %s620_s15 = smov [#allocation5]   ;;  %s526_s19 = scalar_lea.hbm %s738_s1, 384 }
   0x3   :  { %s27_s16 = sshll.u32 %s620_s15, 4  ;;  %p527_p0 = scmp.ne.s32.totalorder %s738_s1, %s526_s19  ;;  %s28_s16 = int_to_ptr.vmem [resolvable:$true] %s27_s16 }
   0x4   :  { %p530_p1 = scmp.lt.u32.totalorder %s526_s19, %s738_s1 }
   0x6   :  { %p532_p2 = pnand %p530_p1, %p527_p0 }
   0x8   :  { %535 = shalt.err (!%p532_p2)
}
   0x9   :  { %s536_s24 = scalar_lea.vmem %s28_s16, 384  ;;  %p541_p4 = scmp.lt.s32.totalorder %s28_s16, %s28_s16 }
   0xa   :  { %p537_p3 = scmp.ne.s32.totalorder %s28_s16, %s536_s24  ;;  %p542_p5 = scmp.lt.s32.totalorder %s536_s24, %s536_s24 }
   0xc   :  { %p543_p6 = por %p542_p5, %p541_p4 }
   0xe   :  { %p544_p7 = pnand %p543_p6, %p537_p3 }
  0x10   :  { %547 = shalt.err (!%p544_p7)
}
  0x11   :  { %s621_s25 = smov 128   ;;  %s622_s26 = smov 8  }
  0x12   :  { %33 = dma.hbm_to_vmem [thread:$0]  %s738_s1, 384, %s28_s16, [#allocation6], %s621_s25, %s621_s25, %s622_s26  }
  0x13   :  { %s623_s29 = smov [#allocation2]   ;;  %s624_s5 = smov [#allocation7]  }
  0x14   :  { %s18_s30 = sshll.u32 %s623_s29, 4  ;;  %s39_s6 = sshll.u32 %s624_s5, 4  ;;  %s19_s30 = int_to_ptr.vmem [resolvable:$true] %s18_s30  ;;  %s40_s6 = int_to_ptr.vmem [resolvable:$true] %s39_s6 }
  0x15   :  { %s548_s9 = scalar_lea.hbm %s737_s0, 128 }
  0x16   :  { %p549_p8 = scmp.ne.s32.totalorder %s737_s0, %s548_s9  ;;  %p552_p9 = scmp.lt.u32.totalorder %s548_s9, %s737_s0 }
  0x18   :  { %p554_p10 = pnand %p552_p9, %p549_p8 }
  0x1a   :  { %557 = shalt.err (!%p554_p10)
}
  0x1b   :  { %s558_s1 = scalar_lea.vmem %s19_s30, 128  ;;  %p563_p12 = scmp.lt.s32.totalorder %s19_s30, %s19_s30 }
  0x1c   :  { %p559_p11 = scmp.ne.s32.totalorder %s19_s30, %s558_s1  ;;  %p564_p13 = scmp.lt.s32.totalorder %s558_s1, %s558_s1 }
  0x1e   :  { %p565_p0 = por %p564_p13, %p563_p12 }
  0x20   :  { %p566_p1 = pnand %p565_p0, %p559_p11 }
  0x22   :  { %569 = shalt.err (!%p566_p1)
}
  0x23   :  { %21 = dma.hbm_to_vmem [thread:$0]  %s737_s0, 128, %s19_s30, [#allocation3]  }
  0x24   :  { %s570_s18 = scalar_lea.hbm %s739_s2, 4096 }
  0x25   :  { %p571_p2 = scmp.ne.s32.totalorder %s739_s2, %s570_s18  ;;  %p574_p3 = scmp.lt.u32.totalorder %s570_s18, %s739_s2 }
  0x27   :  { %p576_p4 = pnand %p574_p3, %p571_p2 }
  0x29   :  { %579 = shalt.err (!%p576_p4)
}
  0x2a   :  { %s580_s23 = scalar_lea.vmem %s40_s6, 4096  ;;  %p585_p6 = scmp.lt.s32.totalorder %s40_s6, %s40_s6 }
  0x2b   :  { %p581_p5 = scmp.ne.s32.totalorder %s40_s6, %s580_s23  ;;  %p586_p7 = scmp.lt.s32.totalorder %s580_s23, %s580_s23 }
  0x2d   :  { %p587_p8 = por %p586_p7, %p585_p6 }
  0x2f   :  { %p588_p9 = pnand %p587_p8, %p581_p5 }
  0x31   :  { %591 = shalt.err (!%p588_p9)
}
  0x32   :  { %45 = dma.hbm_to_vmem [thread:$0]  %s739_s2, 4096, %s40_s6, [#allocation6], %s621_s25, %s621_s25, %s622_s26  }
  0x33   :  { %614 = dma.done.wait [#allocation3], 128  }
  0x34   :  { %615 = vsyncadd [#allocation3], 4294967168 }
  0x35   :  { %616 = dma.done.wait [#allocation6], 4480  }
  0x36   :  { %617 = vsyncadd [#allocation6], 4294962816  ;;  %v625_v0 = vmov 0.0|0.0   ;;  %vm626_vm0 = vmmov 0   ;;  %v627_v1 = vmov 0.0   ;;  %v58_v2 = vld [vmem:[#allocation5] sm:$0xff] }
  0x37   :  { %462 = vmatprep.subr.bf16.mxu0 %v625_v0  ;;  %389 = vmatprep.mubr.msk.f32.mxu0 %vm626_vm0, %v627_v1  ;;  %v59_v3 = vld [vmem:[#allocation5 + $0x8] sm:$0xff]  ;;  %v141_v5 = vld [vmem:[#allocation7] sm:$0xff]  ;;  %v142_v6 = vld [vmem:[#allocation7 + $0x8] sm:$0xff]  ;;  %vm66_vm1 = vcmask 195584   ;;  %s628_s30 = smov [#allocation8]  }
  0x38   :  { %465 = vmatprep.subr.bf16.mxu1 %v625_v0  ;;  %424 = vmatprep.mubr.msk.f32.mxu1 %vm626_vm0, %v627_v1  ;;  %v463_v4 = vpack.c.bf16 %v59_v3, %v58_v2  ;;  %v466_v7 = vpack.c.bf16 %v142_v6, %v141_v5  ;;  %v143_v8 = vld [vmem:[#allocation7 + $0x10] sm:$0xff]  ;;  %v144_v9 = vld [vmem:[#allocation7 + $0x18] sm:$0xff]  ;;  %v57_v12 = vld [vmem:[#allocation2] sm:$0xff]  ;;  %s331_s5 = sshll.u32 %s628_s30, 4  ;;  %s332_s5 = int_to_ptr.vmem [resolvable:$true] %s331_s5 }
  0x39   :  { %v60_v10 = vld [vmem:[#allocation5 + $0x10] sm:$0xff]  ;;  %v469_v11 = vpack.c.bf16 %v144_v9, %v143_v8  ;;  %v145_v13 = vld [vmem:[#allocation7 + $0x20] sm:$0xff]  ;;  %v146_v14 = vld [vmem:[#allocation7 + $0x28] sm:$0xff]  ;;  %s592_s6 = scalar_lea.vmem %s332_s5, 128  ;;  %p597_p11 = scmp.lt.s32.totalorder %s332_s5, %s332_s5 }
  0x3a   :  { %464 = vmatpush3.bf16.msra.mxu0 %v463_v4  ;;  %467 = vmatpush3.bf16.msra.mxu1 %v466_v7  ;;  %v472_v15 = vpack.c.bf16 %v146_v14, %v145_v13  ;;  %v147_v16 = vld [vmem:[#allocation7 + $0x30] sm:$0xff]  ;;  %v148_v17 = vld [vmem:[#allocation7 + $0x38] sm:$0xff]  ;;  %v149_v19 = vld [vmem:[#allocation7 + $0x40] sm:$0xff]  ;;  %p593_p10 = scmp.ne.s32.totalorder %s332_s5, %s592_s6  ;;  %p598_p12 = scmp.lt.s32.totalorder %s592_s6, %s592_s6 }
  0x3b   :  { %387 = vmatprep.subr.mxu0 %v627_v1  ;;  %468 = vmatprep.subr.bf16.mxu1 %v625_v0  ;;  %v475_v18 = vpack.c.bf16 %v148_v17, %v147_v16  ;;  %v150_v20 = vld [vmem:[#allocation7 + $0x48] sm:$0xff]  ;;  %v151_v22 = vld [vmem:[#allocation7 + $0x50] sm:$0xff]  ;;  %v152_v23 = vld [vmem:[#allocation7 + $0x58] sm:$0xff] }
  0x3c   :  { %v478_v21 = vpack.c.bf16 %v150_v20, %v149_v19  ;;  %v481_v24 = vpack.c.bf16 %v152_v23, %v151_v22  ;;  %v153_v25 = vld [vmem:[#allocation7 + $0x60] sm:$0xff]  ;;  %v154_v26 = vld [vmem:[#allocation7 + $0x68] sm:$0xff]  ;;  %v155_v28 = vld [vmem:[#allocation7 + $0x70] sm:$0xff]  ;;  %p599_p13 = por %p598_p12, %p597_p11 }
  0x3d   :  { %v484_v27 = vpack.c.bf16 %v154_v26, %v153_v25  ;;  %v156_v29 = vld [vmem:[#allocation7 + $0x78] sm:$0xff]  ;;  %v233_v31 = vld [vmem:[#allocation7 + $0x80] sm:$0xff]  ;;  %v234_v32 = vld [vmem:[#allocation7 + $0x88] sm:$0xff] }
  0x3e   :  { %388 = vmatpush3.msra.mxu0 %v60_v10  ;;  %470 = vmatpush3.bf16.msra.mxu1 %v469_v11  ;;  %v487_v30 = vpack.c.bf16 %v156_v29, %v155_v28  ;;  %v235_v33 = vld [vmem:[#allocation7 + $0x90] sm:$0xff]  ;;  %v490_v34 = vpack.c.bf16 %v234_v32, %v233_v31  ;;  %v236_v35 = vld [vmem:[#allocation7 + $0x98] sm:$0xff]  ;;  %v237_v37 = vld [vmem:[#allocation7 + $0xa0] sm:$0xff]  ;;  %p600_p0 = pnand %p599_p13, %p593_p10 }
  0x3f   :  { %390 = vmatmul.mubr.msk.f32.vlgmr.msra.gmra.mrb[0].mxu0 %vm66_vm1, %v57_v12  ;;  %471 = vmatprep.subr.bf16.mxu1 %v625_v0  ;;  %v493_v36 = vpack.c.bf16 %v236_v35, %v235_v33  ;;  %v238_v38 = vld [vmem:[#allocation7 + $0xa8] sm:$0xff]  ;;  %v239_v40 = vld [vmem:[#allocation7 + $0xb0] sm:$0xff]  ;;  %v240_v41 = vld [vmem:[#allocation7 + $0xb8] sm:$0xff] }
  0x40   :  { %489 = vmatprep.subr.bf16.mxu0 %v625_v0  ;;  %459 = vmatprep.mubr.msk.f32.mxu0 %vm626_vm0, %v627_v1  ;;  %v496_v39 = vpack.c.bf16 %v238_v38, %v237_v37  ;;  %v499_v42 = vpack.c.bf16 %v240_v41, %v239_v40  ;;  %v241_v43 = vld [vmem:[#allocation7 + $0xc0] sm:$0xff]  ;;  %v242_v44 = vld [vmem:[#allocation7 + $0xc8] sm:$0xff]  ;;  %v243_v51 = vld [vmem:[#allocation7 + $0xd0] sm:$0xff] }
  0x41   :  { %491 = vmatpush3.bf16.msra.mxu0 %v490_v34  ;;  %v502_v45 = vpack.c.bf16 %v242_v44, %v241_v43  ;;  %v341_v46 = vld [vmem:[%s740_s3] ss:$0 sm:$0xff]  ;;  %v244_v52 = vld [vmem:[#allocation7 + $0xd8] sm:$0xff]  ;;  %v246_v55 = vld [vmem:[#allocation7 + $0xe8] sm:$0xff] }
  0x42   :  { %473 = vmatpush3.bf16.msra.mxu1 %v472_v15  ;;  %492 = vmatprep.subr.bf16.mxu0 %v625_v0  ;;  %v505_v53 = vpack.c.bf16 %v244_v52, %v243_v51  ;;  %v245_v54 = vld [vmem:[#allocation7 + $0xe0] sm:$0xff]  ;;  %v247_v57 = vld [vmem:[#allocation7 + $0xf0] sm:$0xff]  ;;  %v248_v58 = vld [vmem:[#allocation7 + $0xf8] sm:$0xff] }
  0x43   :  { %474 = vmatprep.subr.bf16.mxu1 %v625_v0  ;;  %v508_v56 = vpack.c.bf16 %v246_v55, %v245_v54  ;;  %v511_v59 = vpack.c.bf16 %v248_v58, %v247_v57  ;;  %v343_v60 = vld [vmem:[%s740_s3 + $0x1] ss:$0 sm:$0xff]  ;;  %v344_v2 = vld [vmem:[%s740_s3 + $0x2] ss:$0 sm:$0xff] }
  0x45   :  { %494 = vmatpush3.bf16.msra.mxu0 %v493_v36 }
  0x46   :  { %476 = vmatpush3.bf16.msra.mxu1 %v475_v18  ;;  %495 = vmatprep.subr.bf16.mxu0 %v625_v0 }
  0x47   :  { %477 = vmatprep.subr.bf16.mxu1 %v625_v0 }
  0x49   :  { %497 = vmatpush3.bf16.msra.mxu0 %v496_v39 }
  0x4a   :  { %479 = vmatpush3.bf16.msra.mxu1 %v478_v21  ;;  %498 = vmatprep.subr.bf16.mxu0 %v625_v0 }
  0x4b   :  { %480 = vmatprep.subr.bf16.mxu1 %v625_v0 }
  0x4d   :  { %500 = vmatpush3.bf16.msra.mxu0 %v499_v42 }
  0x4e   :  { %482 = vmatpush3.bf16.msra.mxu1 %v481_v24  ;;  %501 = vmatprep.subr.bf16.mxu0 %v625_v0 }
  0x4f   :  { %483 = vmatprep.subr.bf16.mxu1 %v625_v0 }
  0x51   :  { %503 = vmatpush3.bf16.msra.mxu0 %v502_v45 }
  0x52   :  { %485 = vmatpush3.bf16.msra.mxu1 %v484_v27  ;;  %504 = vmatprep.subr.bf16.mxu0 %v625_v0 }
  0x53   :  { %486 = vmatprep.subr.bf16.mxu1 %v625_v0 }
  0x55   :  { %506 = vmatpush3.bf16.msra.mxu0 %v505_v53 }
  0x56   :  { %488 = vmatpush3.bf16.msra.mxu1 %v487_v30  ;;  %507 = vmatprep.subr.bf16.mxu0 %v625_v0 }
  0x59   :  { %509 = vmatpush3.bf16.msra.mxu0 %v508_v56 }
  0x5a   :  { %510 = vmatprep.subr.bf16.mxu0 %v625_v0 }
  0x5d   :  { %512 = vmatpush3.bf16.msra.mxu0 %v511_v59 }
 0x112   :  { %v136_v47 = vpop.f32.mrb[0].mxu0 }
 0x113   :  { %v137_v48 = vadd.f32 %v341_v46, %v136_v47  ;;  %v391_v49 = vpop.f32.mrb[1].mxu0 }
 0x115   :  { %522 = vtanh.f32 %v137_v48 }
 0x11f   :  { %v523_v50 = vpop.eup %522 }
 0x120   :  { %425 = vmatmul.mubr.f32.vlgmr.msra.gmra.mrb[0].mxu1 %v523_v50 }
 0x1f3   :  { %v228_v61 = vpop.f32.mrb[0].mxu1 }
 0x1f4   :  { %v229_v62 = vadd.f32 %v343_v60, %v228_v61  ;;  %v426_v63 = vpop.f32.mrb[1].mxu1 }
 0x1f6   :  { %524 = vtanh.f32 %v229_v62 }
 0x200   :  { %v525_v1 = vpop.eup %524 }
 0x201   :  { %460 = vmatmul.mubr.f32.vlgmr.msra.gmra.mrb[2].mxu0 %v525_v1 }
 0x2d4   :  { %v320_v3 = vpop.f32.mrb[2].mxu0 }
 0x2d5   :  { %v321_v4 = vadd.f32 %v344_v2, %v320_v3  ;;  %v461_v0 = vpop.f32.mrb[3].mxu0 }
 0x2d7   :  { %324 = vst [vmem:[#allocation8] sm:$0xff] %v321_v4 }
 0x2d8   :  { %603 = shalt.err (!%p600_p0)
}
 0x2d9   :  { %s604_s9 = scalar_lea.hbm %s741_s4, 128 }
 0x2da   :  { %p605_p1 = scmp.ne.s32.totalorder %s741_s4, %s604_s9  ;;  %p608_p2 = scmp.lt.u32.totalorder %s604_s9, %s741_s4 }
 0x2dc   :  { %p610_p3 = pnand %p608_p2, %p605_p1 }
 0x2de   :  { %613 = shalt.err (!%p610_p3)
}
 0x2df   :  { %334 = dma.vmem_to_hbm [thread:$0]  %s332_s5, 128, %s741_s4, [#allocation4]  }
 0x2e0   :  { %618 = dma.done.wait [#allocation4], 128  }
 0x2e1   :  { %619 = vsyncadd [#allocation4], 4294967168 }
 0x2e2   :  { %338 = vsyncpa [#allocation3], 1 }
 0x2e3   :  { %339 = vsyncpa [#allocation6], 1 }
 0x2e4   :  { %340 = vsyncpa [#allocation4], 1 }

</bundles_post_ra>
